<compile_context>
chip_gen: v7x
topology: tpu7x:2x2x1
jax: 0.10.0
libtpu: 0.0.40
codegen_flags: <defaults>
</compile_context>

<pallas_src>
import jax
import jax.numpy as jnp
from jax.experimental import pallas as pl
from jax.experimental.pallas import tpu as pltpu

_MIB = 1024 * 1024


def convmlp_kernel(x_ref, w1_ref, b1_ref, w2_ref, b2_ref, o_ref, acc_ref):
    # x_ref:   (Cin,  TP)    pixel tile: channels on sublanes, pixels on lanes
    # w1_ref:  (Th,   Cin)   fc1 weight chunk (torch conv layout, no transpose)
    # b1_ref:  (Th,   1)     fc1 bias chunk, f32
    # w2_ref:  (Cout, Th)    fc2 weight chunk
    # b2_ref:  (Cout, 1)     fc2 bias, f32
    # o_ref:   (Cout, TP)    output tile
    # acc_ref: (Cout, TP)    f32 accumulator across hidden chunks
    h = pl.program_id(2)

    @pl.when(h == 0)
    def _init():
        acc_ref[...] = jnp.zeros_like(acc_ref)

    # In-kernel cast of the activation to the MXU input dtype (avoids a
    # separate HBM cast pass over x; the VPU cast hides under the MXU).
    x = x_ref[...].astype(w1_ref.dtype)
    hid = jnp.dot(w1_ref[...], x, preferred_element_type=jnp.float32)
    hid = jnp.maximum(hid + b1_ref[...], 0.0)            # bias + ReLU in f32
    acc_ref[...] += jnp.dot(w2_ref[...], hid.astype(w2_ref.dtype),
                            preferred_element_type=jnp.float32)

    @pl.when(h == pl.num_programs(2) - 1)
    def _store():
        o_ref[...] = (acc_ref[...] + b2_ref[...]).astype(o_ref.dtype)


def _phys_vmem_bytes():
    try:
        return int(pltpu.get_tpu_info().vmem_capacity_bytes)
    except Exception:  # conservative default: v7x has 64 MiB per TensorCore
        return 64 * _MIB


def conv_mlp(x_nchw, w1, b1, w2, b2, *, tm=1024, tc_hidden=256,
             compute_dtype=jnp.bfloat16, out_dtype=None):
    """ConvMlp forward.

    x_nchw: (N, Cin, H, W)
    w1: (Chid, Cin)   from Conv2d(Cin, Chid, 1).weight.squeeze()
    b1: (Chid,)
    w2: (Cout, Chid)  from Conv2d(Chid, Cout, 1).weight.squeeze()
    b2: (Cout,)
    Returns (N, Cout, H, W) in `out_dtype` (default: x's dtype).
    """
    N, Cin, H, W = x_nchw.shape
    Chid = w1.shape[0]
    Cout = w2.shape[0]
    HW = H * W
    out_dtype = x_nchw.dtype if out_dtype is None else out_dtype

    x_item = jnp.dtype(x_nchw.dtype).itemsize
    out_item = jnp.dtype(out_dtype).itemsize
    cdt_item = jnp.dtype(compute_dtype).itemsize

    # ---- hidden-dim chunking (only when Chid is large) ---------------------
    if Chid <= max(512, tc_hidden):
        tc_h = Chid                                   # single chunk, no padding
    else:
        tc_h = max(128, (tc_hidden // 128) * 128)     # multiple of 128 (layout)
    chid_p = pl.cdiv(Chid, tc_h) * tc_h
    num_h = chid_p // tc_h

    # ---- pixel tile: lane-dense (multiple of 128), sized from VMEM budget ---
    per_pixel_bytes = (2 * Cin * x_item + 2 * Cout * out_item   # x/out dbl-buf
                       + 4 * Cout                               # f32 accumulator
                       + 4 * tc_h)                              # f32 hidden chunk
    tm_cap = max(128, (24 * _MIB // per_pixel_bytes) // 128 * 128)
    tm_p = min(tm, pl.cdiv(HW, 128) * 128, tm_cap)
    # v7x has 2 TensorCores: make sure a "parallel" axis has >= 2 programs.
    if N * pl.cdiv(HW, tm_p) < 2 and HW > 128:
        tm_p = max(128, pl.cdiv(pl.cdiv(HW, 2), 128) * 128)

    grid = (N, pl.cdiv(HW, tm_p), num_h)

    # ---- operands (no pad / cast HBM passes over x) -------------------------
    x3 = x_nchw.reshape(N, Cin, HW)                   # pure reshape, no copy
    w1c = w1.astype(compute_dtype)                    # (Chid, Cin), tiny
    w2c = w2.astype(compute_dtype)                    # (Cout, Chid), tiny
    b1c = b1.astype(jnp.float32).reshape(Chid, 1)
    b2c = b2.astype(jnp.float32).reshape(Cout, 1)
    if chid_p != Chid:
        # Zero-pad hidden dim: padded channels give relu(0+0)=0 and contribute 0.
        w1c = jnp.pad(w1c, ((0, chid_p - Chid), (0, 0)))
        b1c = jnp.pad(b1c, ((0, chid_p - Chid), (0, 0)))
        w2c = jnp.pad(w2c, ((0, 0), (0, chid_p - Chid)))

    # ---- VMEM budget (true dtypes; single-buffered invariants) --------------
    w_bufs = 1 if num_h == 1 else 2
    needed = (2 * Cin * tm_p * x_item                 # x tile, double-buffered
              + 2 * Cout * tm_p * out_item            # out tile, double-buffered
              + w_bufs * (tc_h * Cin + Cout * tc_h) * cdt_item
              + w_bufs * tc_h * 4 + Cout * 4          # biases
              + Cout * tm_p * 4                       # f32 accumulator scratch
              + tc_h * tm_p * 4)                      # f32 hidden intermediate
    phys = _phys_vmem_bytes()
    vmem_limit = int(max(16 * _MIB, min(phys - 12 * _MIB, needed + 8 * _MIB)))

    cost = pl.CostEstimate(
        flops=2 * N * HW * (Cin * Chid + Chid * Cout),
        transcendentals=0,
        bytes_accessed=(x3.size * x_item
                        + (w1c.size + w2c.size) * cdt_item
                        + (b1c.size + b2c.size) * 4
                        + N * Cout * HW * out_item),
    )

    def build(single_buffer_invariant):
        def spec(shape, imap, invariant):
            if single_buffer_invariant and invariant:
                return pl.BlockSpec(shape, imap, pipeline_mode=pl.Buffered(1))
            return pl.BlockSpec(shape, imap)

        w_inv = num_h == 1  # weights are grid-invariant iff single hidden chunk
        return pl.pallas_call(
            convmlp_kernel,
            out_shape=jax.ShapeDtypeStruct((N, Cout, HW), out_dtype),
            grid=grid,
            in_specs=[
                # batch dim squeezed -> kernel sees (Cin, tm_p); block index is
                # constant over h so the x tile stays resident across hidden chunks
                pl.BlockSpec((None, Cin, tm_p), lambda n, p, h: (n, 0, p)),
                spec((tc_h, Cin), lambda n, p, h: (h, 0), w_inv),
                spec((tc_h, 1), lambda n, p, h: (h, 0), w_inv),
                spec((Cout, tc_h), lambda n, p, h: (0, h), w_inv),
                spec((Cout, 1), lambda n, p, h: (0, 0), True),
            ],
            out_specs=pl.BlockSpec((None, Cout, tm_p), lambda n, p, h: (n, 0, p)),
            scratch_shapes=[pltpu.VMEM((Cout, tm_p), jnp.float32)],
            compiler_params=pltpu.CompilerParams(
                dimension_semantics=("parallel", "parallel", "arbitrary"),
                vmem_limit_bytes=vmem_limit,
            ),
            cost_estimate=cost,
        )

    try:
        out3 = build(True)(x3, w1c, b1c, w2c, b2c)
    except Exception:
        # Fallback if pipeline_mode / Buffered(1) is unavailable in this build.
        out3 = build(False)(x3, w1c, b1c, w2c, b2c)

    # (N, Cout, H*W) -> NCHW: pure reshape, no slice, no transpose.
    return out3.reshape(N, Cout, H, W)


def reference(x_nchw, w1, b1, w2, b2):
    # Pure-JAX reference of the torch forward (1x1 convs as einsums).
    h = jnp.einsum("nchw,oc->nohw", x_nchw, w1) + b1[None, :, None, None]
    h = jnp.maximum(h, 0.0)
    return jnp.einsum("nchw,oc->nohw", h, w2) + b2[None, :, None, None]


if __name__ == "__main__":
    key = jax.random.PRNGKey(0)

    # --- Test 1: shapes implied by ConvMlp(in_features=4, hidden_features=8) ---
    N, Cin, H, W = 2, 4, 16, 16
    Chid, Cout = 8, Cin  # out_features defaults to in_features
    kx, k1, kb1, k2, kb2 = jax.random.split(key, 5)
    x = jax.random.normal(kx, (N, Cin, H, W), dtype=jnp.float32)
    w1 = jax.random.normal(k1, (Chid, Cin), dtype=jnp.float32) * 0.1
    b1 = jax.random.normal(kb1, (Chid,), dtype=jnp.float32) * 0.1
    w2 = jax.random.normal(k2, (Cout, Chid), dtype=jnp.float32) * 0.1
    b2 = jax.random.normal(kb2, (Cout,), dtype=jnp.float32) * 0.1
    ref = reference(x, w1, b1, w2, b2)

    out_f32 = jax.block_until_ready(
        conv_mlp(x, w1, b1, w2, b2, compute_dtype=jnp.float32))
    assert out_f32.shape == (N, Cout, H, W)
    assert jnp.allclose(out_f32, ref, atol=1e-5, rtol=1e-5)

    out_bf16 = jax.block_until_ready(
        conv_mlp(x, w1, b1, w2, b2, compute_dtype=jnp.bfloat16))
    assert out_bf16.shape == (N, Cout, H, W)
    assert jnp.allclose(out_bf16, ref, atol=3e-2, rtol=3e-2)

    # --- Test 2: non-128-multiple feature map + hidden-dim tiling path ---------
    N2, Cin2, H2, W2, Chid2, Cout2 = 1, 16, 14, 14, 640, 16
    k = jax.random.split(key, 6)
    x2 = jax.random.normal(k[0], (N2, Cin2, H2, W2), dtype=jnp.float32)
    w1b = jax.random.normal(k[1], (Chid2, Cin2), dtype=jnp.float32) * 0.1
    b1b = jax.random.normal(k[2], (Chid2,), dtype=jnp.float32) * 0.1
    w2b = jax.random.normal(k[3], (Cout2, Chid2), dtype=jnp.float32) * 0.1
    b2b = jax.random.normal(k[4], (Cout2,), dtype=jnp.float32) * 0.1
    ref2 = reference(x2, w1b, b1b, w2b, b2b)

    out2_f32 = jax.block_until_ready(
        conv_mlp(x2, w1b, b1b, w2b, b2b, compute_dtype=jnp.float32))
    assert out2_f32.shape == (N2, Cout2, H2, W2)
    assert jnp.allclose(out2_f32, ref2, atol=1e-3, rtol=1e-3)

    out2_bf16 = jax.block_until_ready(
        conv_mlp(x2, w1b, b1b, w2b, b2b, compute_dtype=jnp.bfloat16))
    assert out2_bf16.shape == (N2, Cout2, H2, W2)
    assert jnp.allclose(out2_bf16, ref2, atol=6e-2, rtol=6e-2)

    print("KERNEL_OK")
</pallas_src>

<mosaic_0001>
module attributes {stable_mosaic.version = 11 : i64} {
  func.func @convmlp_kernel(%arg0: i32, %arg1: i32, %arg2: i32, %arg3: memref<1x4x256xf32, #tpu.memory_space<vmem>>, %arg4: memref<8x4xf32, #tpu.memory_space<vmem>>, %arg5: memref<8x1xf32, #tpu.memory_space<vmem>>, %arg6: memref<4x8xf32, #tpu.memory_space<vmem>>, %arg7: memref<4x1xf32, #tpu.memory_space<vmem>>, %arg8: memref<1x4x256xf32, #tpu.memory_space<vmem>>, %arg9: memref<4x256xf32, #tpu.memory_space<vmem>>) attributes {dimension_semantics = [#tpu.dimension_semantics<parallel>, #tpu.dimension_semantics<parallel>, #tpu.dimension_semantics<arbitrary>], iteration_bounds = array<i64: 2, 1, 1>, scalar_prefetch = 0 : i64, scratch_operands = 1 : i64, tpu.core_type = #tpu.core_type<tc>, window_params = [{transform_indices = @transform_0, window_bounds = array<i64: 1, 4, 256>}, {pipeline_mode = #tpu.pipeline_mode<synchronous>, transform_indices = @transform_1, window_bounds = array<i64: 8, 4>}, {pipeline_mode = #tpu.pipeline_mode<synchronous>, transform_indices = @transform_2, window_bounds = array<i64: 8, 1>}, {pipeline_mode = #tpu.pipeline_mode<synchronous>, transform_indices = @transform_3, window_bounds = array<i64: 4, 8>}, {pipeline_mode = #tpu.pipeline_mode<synchronous>, transform_indices = @transform_4, window_bounds = array<i64: 4, 1>}, {transform_indices = @transform_5, window_bounds = array<i64: 1, 4, 256>}]} {
    %c0_i32 = arith.constant 0 : i32
    %0 = arith.cmpi eq, %arg2, %c0_i32 : i32
    %1 = arith.extui %0 : i1 to i32
    %c0_i32_0 = arith.constant 0 : i32
    %2 = arith.cmpi ne, %1, %c0_i32_0 : i32
    scf.if %2 {
      %cst_17 = arith.constant 0.000000e+00 : f32
      %20 = vector.broadcast %cst_17 : f32 to vector<4x256xf32>
      %c0_18 = arith.constant 0 : index
      %c0_19 = arith.constant 0 : index
      %21 = vector.load %arg9[%c0_18, %c0_19] : memref<4x256xf32, #tpu.memory_space<vmem>>, vector<4x256xf32>
      tpu.vector_store %arg9[%c0_18, %c0_19], %20 {strides = array<i32>} : memref<4x256xf32, #tpu.memory_space<vmem>>, vector<4x256xf32>,
    } else {
    }
    %c0 = arith.constant 0 : index
    %c0_1 = arith.constant 0 : index
    %c0_2 = arith.constant 0 : index
    %3 = vector.load %arg3[%c0, %c0_1, %c0_2] : memref<1x4x256xf32, #tpu.memory_space<vmem>>, vector<1x4x256xf32>
    %4 = vector.shape_cast %3 : vector<1x4x256xf32> to vector<4x256xf32>
    %c0_3 = arith.constant 0 : index
    %c0_4 = arith.constant 0 : index
    %5 = vector.load %arg4[%c0_3, %c0_4] : memref<8x4xf32, #tpu.memory_space<vmem>>, vector<8x4xf32>
    %cst = arith.constant dense<0.000000e+00> : vector<8x256xf32>
    %6 = tpu.matmul %5, %4, %cst {dimension_numbers = #tpu.dot_dimension_numbers<[1], [0], [0], [1], [0, 0, 1, 1], [], []>} : vector<8x4xf32>, vector<4x256xf32>, vector<8x256xf32> -> vector<8x256xf32>
    %c0_5 = arith.constant 0 : index
    %c0_6 = arith.constant 0 : index
    %7 = vector.load %arg5[%c0_5, %c0_6] : memref<8x1xf32, #tpu.memory_space<vmem>>, vector<8x1xf32>
    %8 = vector.broadcast %7 : vector<8x1xf32> to vector<8x256xf32>
    %9 = arith.addf %6, %8 : vector<8x256xf32>
    %cst_7 = arith.constant 0.000000e+00 : f32
    %10 = vector.broadcast %cst_7 : f32 to vector<8x256xf32>
    %11 = arith.maximumf %9, %10 : vector<8x256xf32>
    %c0_8 = arith.constant 0 : index
    %c0_9 = arith.constant 0 : index
    %12 = vector.load %arg9[%c0_8, %c0_9] : memref<4x256xf32, #tpu.memory_space<vmem>>, vector<4x256xf32>
    %c0_10 = arith.constant 0 : index
    %c0_11 = arith.constant 0 : index
    %13 = vector.load %arg6[%c0_10, %c0_11] : memref<4x8xf32, #tpu.memory_space<vmem>>, vector<4x8xf32>
    %cst_12 = arith.constant dense<0.000000e+00> : vector<4x256xf32>
    %14 = tpu.matmul %13, %11, %cst_12 {dimension_numbers = #tpu.dot_dimension_numbers<[1], [0], [0], [1], [0, 0, 1, 1], [], []>} : vector<4x8xf32>, vector<8x256xf32>, vector<4x256xf32> -> vector<4x256xf32>
    %15 = arith.addf %12, %14 : vector<4x256xf32>
    %c0_13 = arith.constant 0 : index
    %c0_14 = arith.constant 0 : index
    %16 = vector.load %arg9[%c0_13, %c0_14] : memref<4x256xf32, #tpu.memory_space<vmem>>, vector<4x256xf32>
    tpu.vector_store %arg9[%c0_13, %c0_14], %15 {strides = array<i32>} : memref<4x256xf32, #tpu.memory_space<vmem>>, vector<4x256xf32>,
    %c0_i32_15 = arith.constant 0 : i32
    %17 = arith.cmpi eq, %arg2, %c0_i32_15 : i32
    %18 = arith.extui %17 : i1 to i32
    %c0_i32_16 = arith.constant 0 : i32
    %19 = arith.cmpi ne, %18, %c0_i32_16 : i32
    scf.if %19 {
      %c0_17 = arith.constant 0 : index
      %c0_18 = arith.constant 0 : index
      %20 = vector.load %arg9[%c0_17, %c0_18] : memref<4x256xf32, #tpu.memory_space<vmem>>, vector<4x256xf32>
      %c0_19 = arith.constant 0 : index
      %c0_20 = arith.constant 0 : index
      %21 = vector.load %arg7[%c0_19, %c0_20] : memref<4x1xf32, #tpu.memory_space<vmem>>, vector<4x1xf32>
      %22 = vector.broadcast %21 : vector<4x1xf32> to vector<4x256xf32>
      %23 = arith.addf %20, %22 : vector<4x256xf32>
      %c0_21 = arith.constant 0 : index
      %c0_22 = arith.constant 0 : index
      %c0_23 = arith.constant 0 : index
      %24 = vector.load %arg8[%c0_21, %c0_22, %c0_23] : memref<1x4x256xf32, #tpu.memory_space<vmem>>, vector<1x4x256xf32>
      %25 = vector.shape_cast %24 : vector<1x4x256xf32> to vector<4x256xf32>
      %26 = vector.shape_cast %23 : vector<4x256xf32> to vector<1x4x256xf32>
      tpu.vector_store %arg8[%c0_21, %c0_22, %c0_23], %26 {strides = array<i32>} : memref<1x4x256xf32, #tpu.memory_space<vmem>>, vector<1x4x256xf32>,
    } else {
    }
    return
  }
  func.func @transform_0(%arg0: i32, %arg1: i32, %arg2: i32) -> (i32, i32, i32) {
    %c0_i32 = arith.constant 0 : i32
    %c0_i32_0 = arith.constant 0 : i32
    return %arg0, %c0_i32, %arg1 : i32, i32, i32
  }
  func.func @transform_1(%arg0: i32, %arg1: i32, %arg2: i32) -> (i32, i32) {
    %c0_i32 = arith.constant 0 : i32
    %c0_i32_0 = arith.constant 0 : i32
    return %arg2, %c0_i32 : i32, i32
  }
  func.func @transform_2(%arg0: i32, %arg1: i32, %arg2: i32) -> (i32, i32) {
    %c0_i32 = arith.constant 0 : i32
    %c0_i32_0 = arith.constant 0 : i32
    return %arg2, %c0_i32 : i32, i32
  }
  func.func @transform_3(%arg0: i32, %arg1: i32, %arg2: i32) -> (i32, i32) {
    %c0_i32 = arith.constant 0 : i32
    %c0_i32_0 = arith.constant 0 : i32
    return %c0_i32, %arg2 : i32, i32
  }
  func.func @transform_4(%arg0: i32, %arg1: i32, %arg2: i32) -> (i32, i32) {
    %c0_i32 = arith.constant 0 : i32
    %c0_i32_0 = arith.constant 0 : i32
    %c0_i32_1 = arith.constant 0 : i32
    return %c0_i32, %c0_i32_0 : i32, i32
  }
  func.func @transform_5(%arg0: i32, %arg1: i32, %arg2: i32) -> (i32, i32, i32) {
    %c0_i32 = arith.constant 0 : i32
    %c0_i32_0 = arith.constant 0 : i32
    return %arg0, %c0_i32, %arg1 : i32, i32, i32
  }
}

module attributes {stable_mosaic.version = 11 : i64} {
  func.func @convmlp_kernel(%arg0: i32, %arg1: i32, %arg2: i32, %arg3: memref<1x4x256xf32, #tpu.memory_space<vmem>>, %arg4: memref<8x4xf32, #tpu.memory_space<vmem>>, %arg5: memref<8x1xf32, #tpu.memory_space<vmem>>, %arg6: memref<4x8xf32, #tpu.memory_space<vmem>>, %arg7: memref<4x1xf32, #tpu.memory_space<vmem>>, %arg8: memref<1x4x256xf32, #tpu.memory_space<vmem>>, %arg9: memref<4x256xf32, #tpu.memory_space<vmem>>) attributes {dimension_semantics = [#tpu.dimension_semantics<parallel>, #tpu.dimension_semantics<parallel>, #tpu.dimension_semantics<arbitrary>], iteration_bounds = array<i64: 2, 1, 1>, scalar_prefetch = 0 : i64, scratch_operands = 1 : i64, tpu.core_type = #tpu.core_type<tc>, window_params = [{transform_indices = @transform_0, window_bounds = array<i64: 1, 4, 256>}, {transform_indices = @transform_1, window_bounds = array<i64: 8, 4>}, {transform_indices = @transform_2, window_bounds = array<i64: 8, 1>}, {transform_indices = @transform_3, window_bounds = array<i64: 4, 8>}, {pipeline_mode = #tpu.pipeline_mode<synchronous>, transform_indices = @transform_4, window_bounds = array<i64: 4, 1>}, {transform_indices = @transform_5, window_bounds = array<i64: 1, 4, 256>}]} {
    %c0_i32 = arith.constant 0 : i32
    %0 = arith.cmpi eq, %arg2, %c0_i32 : i32
    %1 = arith.extui %0 : i1 to i32
    %c0_i32_0 = arith.constant 0 : i32
    %2 = arith.cmpi ne, %1, %c0_i32_0 : i32
    scf.if %2 {
      %cst_17 = arith.constant 0.000000e+00 : f32
      %20 = vector.broadcast %cst_17 : f32 to vector<4x256xf32>
      %c0_18 = arith.constant 0 : index
      %c0_19 = arith.constant 0 : index
      %21 = vector.load %arg9[%c0_18, %c0_19] : memref<4x256xf32, #tpu.memory_space<vmem>>, vector<4x256xf32>
      tpu.vector_store %arg9[%c0_18, %c0_19], %20 {strides = array<i32>} : memref<4x256xf32, #tpu.memory_space<vmem>>, vector<4x256xf32>,
    } else {
    }
    %c0 = arith.constant 0 : index
    %c0_1 = arith.constant 0 : index
    %c0_2 = arith.constant 0 : index
    %3 = vector.load %arg3[%c0, %c0_1, %c0_2] : memref<1x4x256xf32, #tpu.memory_space<vmem>>, vector<1x4x256xf32>
    %4 = vector.shape_cast %3 : vector<1x4x256xf32> to vector<4x256xf32>
    %c0_3 = arith.constant 0 : index
    %c0_4 = arith.constant 0 : index
    %5 = vector.load %arg4[%c0_3, %c0_4] : memref<8x4xf32, #tpu.memory_space<vmem>>, vector<8x4xf32>
    %cst = arith.constant dense<0.000000e+00> : vector<8x256xf32>
    %6 = tpu.matmul %5, %4, %cst {dimension_numbers = #tpu.dot_dimension_numbers<[1], [0], [0], [1], [0, 0, 1, 1], [], []>} : vector<8x4xf32>, vector<4x256xf32>, vector<8x256xf32> -> vector<8x256xf32>
    %c0_5 = arith.constant 0 : index
    %c0_6 = arith.constant 0 : index
    %7 = vector.load %arg5[%c0_5, %c0_6] : memref<8x1xf32, #tpu.memory_space<vmem>>, vector<8x1xf32>
    %8 = vector.broadcast %7 : vector<8x1xf32> to vector<8x256xf32>
    %9 = arith.addf %6, %8 : vector<8x256xf32>
    %cst_7 = arith.constant 0.000000e+00 : f32
    %10 = vector.broadcast %cst_7 : f32 to vector<8x256xf32>
    %11 = arith.maximumf %9, %10 : vector<8x256xf32>
    %c0_8 = arith.constant 0 : index
    %c0_9 = arith.constant 0 : index
    %12 = vector.load %arg9[%c0_8, %c0_9] : memref<4x256xf32, #tpu.memory_space<vmem>>, vector<4x256xf32>
    %c0_10 = arith.constant 0 : index
    %c0_11 = arith.constant 0 : index
    %13 = vector.load %arg6[%c0_10, %c0_11] : memref<4x8xf32, #tpu.memory_space<vmem>>, vector<4x8xf32>
    %cst_12 = arith.constant dense<0.000000e+00> : vector<4x256xf32>
    %14 = tpu.matmul %13, %11, %cst_12 {dimension_numbers = #tpu.dot_dimension_numbers<[1], [0], [0], [1], [0, 0, 1, 1], [], []>} : vector<4x8xf32>, vector<8x256xf32>, vector<4x256xf32> -> vector<4x256xf32>
    %15 = arith.addf %12, %14 : vector<4x256xf32>
    %c0_13 = arith.constant 0 : index
    %c0_14 = arith.constant 0 : index
    %16 = vector.load %arg9[%c0_13, %c0_14] : memref<4x256xf32, #tpu.memory_space<vmem>>, vector<4x256xf32>
    tpu.vector_store %arg9[%c0_13, %c0_14], %15 {strides = array<i32>} : memref<4x256xf32, #tpu.memory_space<vmem>>, vector<4x256xf32>,
    %c0_i32_15 = arith.constant 0 : i32
    %17 = arith.cmpi eq, %arg2, %c0_i32_15 : i32
    %18 = arith.extui %17 : i1 to i32
    %c0_i32_16 = arith.constant 0 : i32
    %19 = arith.cmpi ne, %18, %c0_i32_16 : i32
    scf.if %19 {
      %c0_17 = arith.constant 0 : index
      %c0_18 = arith.constant 0 : index
      %20 = vector.load %arg9[%c0_17, %c0_18] : memref<4x256xf32, #tpu.memory_space<vmem>>, vector<4x256xf32>
      %c0_19 = arith.constant 0 : index
      %c0_20 = arith.constant 0 : index
      %21 = vector.load %arg7[%c0_19, %c0_20] : memref<4x1xf32, #tpu.memory_space<vmem>>, vector<4x1xf32>
      %22 = vector.broadcast %21 : vector<4x1xf32> to vector<4x256xf32>
      %23 = arith.addf %20, %22 : vector<4x256xf32>
      %c0_21 = arith.constant 0 : index
      %c0_22 = arith.constant 0 : index
      %c0_23 = arith.constant 0 : index
      %24 = vector.load %arg8[%c0_21, %c0_22, %c0_23] : memref<1x4x256xf32, #tpu.memory_space<vmem>>, vector<1x4x256xf32>
      %25 = vector.shape_cast %24 : vector<1x4x256xf32> to vector<4x256xf32>
      %26 = vector.shape_cast %23 : vector<4x256xf32> to vector<1x4x256xf32>
      tpu.vector_store %arg8[%c0_21, %c0_22, %c0_23], %26 {strides = array<i32>} : memref<1x4x256xf32, #tpu.memory_space<vmem>>, vector<1x4x256xf32>,
    } else {
    }
    return
  }
  func.func @transform_0(%arg0: i32, %arg1: i32, %arg2: i32) -> (i32, i32, i32) {
    %c0_i32 = arith.constant 0 : i32
    %c0_i32_0 = arith.constant 0 : i32
    return %arg0, %c0_i32, %arg1 : i32, i32, i32
  }
  func.func @transform_1(%arg0: i32, %arg1: i32, %arg2: i32) -> (i32, i32) {
    %c0_i32 = arith.constant 0 : i32
    %c0_i32_0 = arith.constant 0 : i32
    return %arg2, %c0_i32 : i32, i32
  }
  func.func @transform_2(%arg0: i32, %arg1: i32, %arg2: i32) -> (i32, i32) {
    %c0_i32 = arith.constant 0 : i32
    %c0_i32_0 = arith.constant 0 : i32
    return %arg2, %c0_i32 : i32, i32
  }
  func.func @transform_3(%arg0: i32, %arg1: i32, %arg2: i32) -> (i32, i32) {
    %c0_i32 = arith.constant 0 : i32
    %c0_i32_0 = arith.constant 0 : i32
    return %c0_i32, %arg2 : i32, i32
  }
  func.func @transform_4(%arg0: i32, %arg1: i32, %arg2: i32) -> (i32, i32) {
    %c0_i32 = arith.constant 0 : i32
    %c0_i32_0 = arith.constant 0 : i32
    %c0_i32_1 = arith.constant 0 : i32
    return %c0_i32, %c0_i32_0 : i32, i32
  }
  func.func @transform_5(%arg0: i32, %arg1: i32, %arg2: i32) -> (i32, i32, i32) {
    %c0_i32 = arith.constant 0 : i32
    %c0_i32_0 = arith.constant 0 : i32
    return %arg0, %c0_i32, %arg1 : i32, i32, i32
  }
}

</mosaic_0001>

<bundles_post_ra>
// kernel: tpu_custom_call.1
= control target key start
LH: loop header
LB: loop body
LE: loop exit
PB: predicated region body
PF: predicated region fallthrough
CT: control target
= control target key end

     0   :  { %10 = vsyncpa [#allocation4], 0  ;;  %s972_s0 = inlined_call_operand.vmem [shape: f32[2,4,256], index: 0, kind: input, shape index: {}]   ;;  %s973_s1 = inlined_call_operand.vmem [shape: f32[8,4], index: 1, kind: input, shape index: {}]   ;;  %s974_s2 = inlined_call_operand.vmem [shape: f32[8,1], index: 2, kind: input, shape index: {}]   ;;  %s975_s3 = inlined_call_operand.vmem [shape: f32[4,8], index: 3, kind: input, shape index: {}]   ;;  %s976_s4 = inlined_call_operand.vmem [shape: f32[4,1], index: 4, kind: input, shape index: {}]   ;;  %s977_s5 = inlined_call_operand.hbm [shape: f32[2,4,256], index: 5, kind: output, shape index: {}]  }
   0x1   :  { %12 = vsyncpa [#allocation4 + $0x1], 0  ;;  %s848_s18 = smov 0   ;;  %s850_s19 = smov 0  }
   0x2   :  { %s852_s20 = smov 0   ;;  %s854_s21 = smov 0  }
   0x3   :  { %s856_s22 = smov 0   ;;  %s858_s23 = smov 0  }
   0x4 LB: > { %s652_s24 = sadd.s32 4294967295, %s812_s23   ;;  %s653_s25 = sadd.s32 4294967294, %s812_s23   ;;  %s812_s23 = sphi %s858_s23, %s18_s23   ;;  %s808_s22 = sphi %s856_s22, %s984_s22   ;;  %s804_s21 = sphi %s854_s21, %s983_s21   ;;  %s800_s20 = sphi %s852_s20, %s982_s20   ;;  %s796_s19 = sphi %s850_s19, %s981_s19   ;;  %s792_s18 = sphi %s848_s18, %s980_s18  }
   0x5   : > { %s37_s26 = sadd.s32 1, %s808_s22  ;;  %s173_s27 = sadd.s32 1, %s800_s20 }
   0x6   : > { %p39_p0 = scmp.ge.s32.totalorder %s37_s26, 2  ;;  %p183_p1 = scmp.ne.s32.totalorder %s800_s20, %s796_s19 }
   0x7   : > { %p184_p2 = scmp.eq.s32.totalorder %s652_s24, 1  ;;  %p189_p3 = scmp.ne.s32.totalorder %s796_s19, %s792_s18 }
   0x8   : > { %s986_s26 = smov (%p39_p0, %s37_s26), 0  ;;  %p190_p5 = scmp.eq.s32.totalorder %s653_s25, 1 }
   0x9   : > { %p888_p4 = por %p184_p2, %p183_p1  ;;  %s168_s29 = ssub.s32 %s808_s22, %s986_s26 }
   0xa   : > { %p659_p6 = scmp.ge.s32.totalorder %s812_s23, 1  ;;  %p171_p7 = scmp.eq.s32.totalorder %s168_s29, 0 }
   0xb   : > { %p895_p8 = por %p190_p5, %p189_p3  ;;  %p245_p9 = scmp.lt.s32.totalorder %s812_s23, 3 }
   0xc   : > { %s901_s6 = scalar_select %p171_p7, %s800_s20, %s173_s27  }
   0xd   : > { %p246_p10 = pnand %p659_p6, %p245_p9 }
   0xe   : > { %p290_p11 = scmp.lt.s32.totalorder (!%p246_p10), %s804_s21, 1  ;;  %v814_v0 = vmov (!%p246_p10), 0.0   ;;  %v815_v1 = vmov (!%p246_p10), 0   ;;  %v319_v2 = vld [vmem:[%s974_s2] sm:$0xff] (!%p246_p10)  ;;  %vm331_vm0 = vcmask (!%p246_p10), 1043456   ;;  %vm327_vm1 = vcmask (!%p246_p10), 31744  }
   0xf   : > { %249 = sbr.rel (%p246_p10) target bundleno = 481 (0x1e1), region = 40  ;;  %400 = vmatprep.mubr.f32.mxu0 (!%p246_p10), %v814_v0  ;;  %732 = vset.pattern.permute.xlu0 (!%p246_p10), %v815_v1  ;;  %v496_v3 = vld [vmem:[%s976_s4] sm:$0xf] (!%p246_p10)  ;;  %vm411_vm2 = vcmask (!%p246_p10), 64512   ;;  %v816_v15 = vmov (!%p246_p10), 839922192   ;;  %v504_v17 = vlaneseq (!%p246_p10) }
  0x10   : > { %322 = vperm.xlu0 (!%p246_p10), %732, %v319_v2   ;;  %479 = vmatprep.mubr.f32.mxu1 (!%p246_p10), %v814_v0  ;;  %v318_v6 = vld [vmem:[%s973_s1] sm:$0xff] (!%p246_p10)  ;;  %v502_v16 = vunpack.c.l.s4 (!%p246_p10), %v816_v15  ;;  %s286_s27 = sand.u32 (!%p246_p10), 1, %s796_s19   ;;  %s673_s7 = sshll.u32 (!%p246_p10), %s804_s21, 7 }
  0x11   : > { %v410_v14 = vld [vmem:[%s975_s3] sm:$0xf] (!%p246_p10)  ;;  %v505_v19 = vshrl.u32 (!%p246_p10), %v504_v17, 7  ;;  %s660_s29 = sshll.u32 (!%p246_p10), %s286_s27, 3  ;;  %s512_s13 = scalar_lea.sflag (!%p246_p10), [#allocation4], %s286_s27 }
  0x12   : > { %v503_v18 = vunpack.c.0.s8 (!%p246_p10), %v502_v16  ;;  %s288_s8 = scalar_lea.vmem (!%p246_p10), [#allocation3], %s660_s29 }
  0x14   : > { %499 = vperm.xlu0 (!%p246_p10), %732, %v496_v3   ;;  %v506_v20 = vsub.s32 (!%p246_p10), %v503_v18, %v505_v19 }
  0x16   : > { %s291_s9 = scalar_select %p290_p11, %s804_s21, 1 }
  0x17   : > { %s817_s21 = smov [#allocation3]  }
  0x18   : > { %s672_s12 = sshll.u32 %s291_s9, 3  ;;  %s528_s9 = sshll.u32 %s288_s8, 4  ;;  %s927_s9 = int_to_ptr.vmem [resolvable:$true] %s528_s9 }
  0x19   : > { %s297_s15 = scalar_lea.vmem %s972_s0, %s672_s12  ;;  %s925_s12 = scalar_lea.hbm %s977_s5, %s673_s7 }
  0x1a   : > { %v317_v4 = vld [vmem:[%s297_s15] sm:$0xff]  ;;  %s734_s14 = scalar_lea.vmem %s927_s9, 128  ;;  %s738_s15 = sshll.u32 %s817_s21, 4  ;;  %s739_s15 = int_to_ptr.vmem [resolvable:$false] %s738_s15 }
  0x1b   : > { %v326_v5 = vcombine.high %v317_v4, %v317_v4  ;;  %p735_p12 = scmp.ne.s32.totalorder %s927_s9, %s734_s14  ;;  %s740_s16 = scalar_lea.vmem %s739_s15, 256 }
  0x1c   : > { %p741_p1 = scmp.lt.s32.totalorder %s927_s9, %s739_s15  ;;  %p742_p2 = scmp.lt.s32.totalorder %s740_s16, %s734_s14 }
  0x1d   : > { %663 = vmatprep.subr.msk.mxu0 %vm331_vm0, %v326_v5  ;;  %p736_p13 = pnand %p735_p12, %p888_p4 }
  0x1e   : > { %664 = vmatpush1.msk.msra.mxu0 %vm331_vm0, %v317_v4  ;;  %p743_p3 = por %p742_p2, %p741_p1 }
  0x1f   : > { %665 = vmatmul.mubr.msk.f32.vlgmr.msra.gmra.mrb[0].mxu0 %vm327_vm1, %v318_v6  ;;  %p737_p0 = pneg %p736_p13 }
  0x21   : > { %p744_p5 = pnand %p743_p3, %p737_p0 }
  0x8f   : > { %v323_v7 = vpop.permute.xlu0 %322 }
  0x93   : > { %v500_v21 = vpop.permute.xlu0 %499 }
  0x94   : > { %v507_v24 = vrot.slane %v500_v21, %v506_v20 }
  0xf2   : > { %v402_v8 = vpop.f32.mrb[0].mxu0 }
  0xf3   : > { %v403_v9 = vadd.f32 %v402_v8, %v323_v7  ;;  %v404_v10 = vpop.f32.mrb[1].mxu0 }
  0xf4   : > { %v405_v11 = vadd.f32 %v404_v10, %v323_v7 }
  0xf5   : > { %v407_v13 = vmax.f32 %v403_v9, 0.0 }
  0xf6   : > { %v408_v12 = vmax.f32 %v405_v11, 0.0 }
  0xf8   : > { %415 = vmatprep.subr.mxu1 %v408_v12 }
  0xf9   : > { %416 = vmatpush1.msra.mxu1 %v407_v13 }
  0xfa   : > { %666 = vmatmul.mubr.msk.f32.vlgmr.msra.gmra.mrb[0].mxu1 %vm411_vm2, %v410_v14 }
 0x1cd   : > { %v481_v22 = vpop.f32.mrb[0].mxu1 }
 0x1ce   : > { %v483_v23 = vpop.f32.mrb[1].mxu1 }
 0x1cf   : > { %v488_v25 = vcombine.low %v481_v22, %v483_v23 }
 0x1d1   : > { %v509_v26 = vadd.f32 %v507_v24, %v488_v25 }
 0x1d3   : > { %510 = vst [vmem:[%s288_s8] sm:$0xff] %v509_v26 }
 0x1d4   : > { %747 = shalt.err (!%p744_p5)
}
 0x1d5   : > { %s748_s17 = scalar_lea.hbm %s925_s12, 128  ;;  %s752_s27 = scalar_lea.hbm %s977_s5, 256 }
 0x1d6   : > { %p749_p6 = scmp.ne.s32.totalorder %s925_s12, %s748_s17  ;;  %p753_p10 = scmp.lt.u32.totalorder %s925_s12, %s977_s5 }
 0x1d7   : > { %p754_p11 = scmp.lt.u32.totalorder %s752_s27, %s748_s17  ;;  %p756_p13 = scmp.lt.u32.totalorder %s748_s17, %s925_s12 }
 0x1d8   : > { %p750_p7 = pnand %p749_p6, %p888_p4 }
 0x1d9   : > { %p755_p12 = por %p754_p11, %p753_p10 }
 0x1da   : > { %p751_p9 = pneg %p750_p7 }
 0x1db   : > { %p757_p0 = por %p756_p13, %p755_p12 }
 0x1dd   : > { %p758_p1 = pnand %p757_p0, %p751_p9 }
 0x1df   : > { %761 = shalt.err (!%p758_p1)
}
 0x1e0   : > { %674 = dma.vmem_to_hbm [thread:$0]  (%p888_p4), %s927_s9, 128, %s925_s12, %s512_s13  }
 0x1e1 PF: > { %p680_p2 = scmp.ge.s32.totalorder %s812_s23, 2  ;;  %s540_s8 = sand.u32 1, %s792_s18  }
 0x1e2   : > { %s541_s10 = scalar_lea.sflag [#allocation4], %s540_s8 }
 0x1e3   : > { %p677_p3 = pnand %p680_p2, %p895_p8 }
 0x1e5   : > { %787 = dma.done.wait (!%p677_p3), %s541_s10, 128  }
 0x1e6   : > { %789 = vsyncadd (!%p677_p3), %s541_s10, 4294967168  ;;  %s18_s23 = sadd.s32 1, %s812_s23   ;;  %s980_s18 = smov %s796_s19 }
 0x1e7   : > { %p15_p5 = scmp.ge.s32.totalorder %s18_s23, 4   ;;  %s981_s19 = smov %s800_s20 }
 0x1e8   : > { %s982_s20 = smov %s901_s6  ;;  %s983_s21 = smov %s808_s22 }
 0x1e9   : > { %s984_s22 = smov %s986_s26  ;;  %17 = sbr.rel (!%p15_p5) target bundleno = 4 (0x4), region = 92 }
 0x1f0   :  { %546 = vsyncpa [#allocation4], 1 }
 0x1f1   :  { %548 = vsyncpa [#allocation4 + $0x1], 1 }

// kernel: tpu_custom_call.1
= control target key start
LH: loop header
LB: loop body
LE: loop exit
PB: predicated region body
PF: predicated region fallthrough
CT: control target
= control target key end

     0   :  { %10 = vsyncpa [#allocation4], 0  ;;  %s972_s0 = inlined_call_operand.vmem [shape: f32[2,4,256], index: 0, kind: input, shape index: {}]   ;;  %s973_s1 = inlined_call_operand.vmem [shape: f32[8,4], index: 1, kind: input, shape index: {}]   ;;  %s974_s2 = inlined_call_operand.vmem [shape: f32[8,1], index: 2, kind: input, shape index: {}]   ;;  %s975_s3 = inlined_call_operand.vmem [shape: f32[4,8], index: 3, kind: input, shape index: {}]   ;;  %s976_s4 = inlined_call_operand.vmem [shape: f32[4,1], index: 4, kind: input, shape index: {}]   ;;  %s977_s5 = inlined_call_operand.hbm [shape: f32[2,4,256], index: 5, kind: output, shape index: {}]  }
   0x1   :  { %12 = vsyncpa [#allocation4 + $0x1], 0  ;;  %s848_s18 = smov 0   ;;  %s850_s19 = smov 0  }
   0x2   :  { %s852_s20 = smov 0   ;;  %s854_s21 = smov 0  }
   0x3   :  { %s856_s22 = smov 0   ;;  %s858_s23 = smov 0  }
   0x4 LB: > { %s652_s24 = sadd.s32 4294967295, %s812_s23   ;;  %s653_s25 = sadd.s32 4294967294, %s812_s23   ;;  %s812_s23 = sphi %s858_s23, %s18_s23   ;;  %s808_s22 = sphi %s856_s22, %s984_s22   ;;  %s804_s21 = sphi %s854_s21, %s983_s21   ;;  %s800_s20 = sphi %s852_s20, %s982_s20   ;;  %s796_s19 = sphi %s850_s19, %s981_s19   ;;  %s792_s18 = sphi %s848_s18, %s980_s18  }
   0x5   : > { %s37_s26 = sadd.s32 1, %s808_s22  ;;  %s173_s27 = sadd.s32 1, %s800_s20 }
   0x6   : > { %p39_p0 = scmp.ge.s32.totalorder %s37_s26, 2  ;;  %p183_p1 = scmp.ne.s32.totalorder %s800_s20, %s796_s19 }
   0x7   : > { %p184_p2 = scmp.eq.s32.totalorder %s652_s24, 1  ;;  %p189_p3 = scmp.ne.s32.totalorder %s796_s19, %s792_s18 }
   0x8   : > { %s986_s26 = smov (%p39_p0, %s37_s26), 0  ;;  %p190_p5 = scmp.eq.s32.totalorder %s653_s25, 1 }
   0x9   : > { %p888_p4 = por %p184_p2, %p183_p1  ;;  %s168_s29 = ssub.s32 %s808_s22, %s986_s26 }
   0xa   : > { %p659_p6 = scmp.ge.s32.totalorder %s812_s23, 1  ;;  %p171_p7 = scmp.eq.s32.totalorder %s168_s29, 0 }
   0xb   : > { %p895_p8 = por %p190_p5, %p189_p3  ;;  %p245_p9 = scmp.lt.s32.totalorder %s812_s23, 3 }
   0xc   : > { %s901_s6 = scalar_select %p171_p7, %s800_s20, %s173_s27  }
   0xd   : > { %p246_p10 = pnand %p659_p6, %p245_p9 }
   0xe   : > { %p290_p11 = scmp.lt.s32.totalorder (!%p246_p10), %s804_s21, 1  ;;  %v814_v0 = vmov (!%p246_p10), 0.0   ;;  %v815_v1 = vmov (!%p246_p10), 0   ;;  %v319_v2 = vld [vmem:[%s974_s2] sm:$0xff] (!%p246_p10)  ;;  %vm331_vm0 = vcmask (!%p246_p10), 1043456   ;;  %vm327_vm1 = vcmask (!%p246_p10), 31744  }
   0xf   : > { %249 = sbr.rel (%p246_p10) target bundleno = 481 (0x1e1), region = 40  ;;  %400 = vmatprep.mubr.f32.mxu0 (!%p246_p10), %v814_v0  ;;  %732 = vset.pattern.permute.xlu0 (!%p246_p10), %v815_v1  ;;  %v496_v3 = vld [vmem:[%s976_s4] sm:$0xf] (!%p246_p10)  ;;  %vm411_vm2 = vcmask (!%p246_p10), 64512   ;;  %v816_v15 = vmov (!%p246_p10), 839922192   ;;  %v504_v17 = vlaneseq (!%p246_p10) }
  0x10   : > { %322 = vperm.xlu0 (!%p246_p10), %732, %v319_v2   ;;  %479 = vmatprep.mubr.f32.mxu1 (!%p246_p10), %v814_v0  ;;  %v318_v6 = vld [vmem:[%s973_s1] sm:$0xff] (!%p246_p10)  ;;  %v502_v16 = vunpack.c.l.s4 (!%p246_p10), %v816_v15  ;;  %s286_s27 = sand.u32 (!%p246_p10), 1, %s796_s19   ;;  %s673_s7 = sshll.u32 (!%p246_p10), %s804_s21, 7 }
  0x11   : > { %v410_v14 = vld [vmem:[%s975_s3] sm:$0xf] (!%p246_p10)  ;;  %v505_v19 = vshrl.u32 (!%p246_p10), %v504_v17, 7  ;;  %s660_s29 = sshll.u32 (!%p246_p10), %s286_s27, 3  ;;  %s512_s13 = scalar_lea.sflag (!%p246_p10), [#allocation4], %s286_s27 }
  0x12   : > { %v503_v18 = vunpack.c.0.s8 (!%p246_p10), %v502_v16  ;;  %s288_s8 = scalar_lea.vmem (!%p246_p10), [#allocation3], %s660_s29 }
  0x14   : > { %499 = vperm.xlu0 (!%p246_p10), %732, %v496_v3   ;;  %v506_v20 = vsub.s32 (!%p246_p10), %v503_v18, %v505_v19 }
  0x16   : > { %s291_s9 = scalar_select %p290_p11, %s804_s21, 1 }
  0x17   : > { %s817_s21 = smov [#allocation3]  }
  0x18   : > { %s672_s12 = sshll.u32 %s291_s9, 3  ;;  %s528_s9 = sshll.u32 %s288_s8, 4  ;;  %s927_s9 = int_to_ptr.vmem [resolvable:$true] %s528_s9 }
  0x19   : > { %s297_s15 = scalar_lea.vmem %s972_s0, %s672_s12  ;;  %s925_s12 = scalar_lea.hbm %s977_s5, %s673_s7 }
  0x1a   : > { %v317_v4 = vld [vmem:[%s297_s15] sm:$0xff]  ;;  %s734_s14 = scalar_lea.vmem %s927_s9, 128  ;;  %s738_s15 = sshll.u32 %s817_s21, 4  ;;  %s739_s15 = int_to_ptr.vmem [resolvable:$false] %s738_s15 }
  0x1b   : > { %v326_v5 = vcombine.high %v317_v4, %v317_v4  ;;  %p735_p12 = scmp.ne.s32.totalorder %s927_s9, %s734_s14  ;;  %s740_s16 = scalar_lea.vmem %s739_s15, 256 }
  0x1c   : > { %p741_p1 = scmp.lt.s32.totalorder %s927_s9, %s739_s15  ;;  %p742_p2 = scmp.lt.s32.totalorder %s740_s16, %s734_s14 }
  0x1d   : > { %663 = vmatprep.subr.msk.mxu0 %vm331_vm0, %v326_v5  ;;  %p736_p13 = pnand %p735_p12, %p888_p4 }
  0x1e   : > { %664 = vmatpush1.msk.msra.mxu0 %vm331_vm0, %v317_v4  ;;  %p743_p3 = por %p742_p2, %p741_p1 }
  0x1f   : > { %665 = vmatmul.mubr.msk.f32.vlgmr.msra.gmra.mrb[0].mxu0 %vm327_vm1, %v318_v6  ;;  %p737_p0 = pneg %p736_p13 }
  0x21   : > { %p744_p5 = pnand %p743_p3, %p737_p0 }
  0x8f   : > { %v323_v7 = vpop.permute.xlu0 %322 }
  0x93   : > { %v500_v21 = vpop.permute.xlu0 %499 }
  0x94   : > { %v507_v24 = vrot.slane %v500_v21, %v506_v20 }
  0xf2   : > { %v402_v8 = vpop.f32.mrb[0].mxu0 }
  0xf3   : > { %v403_v9 = vadd.f32 %v402_v8, %v323_v7  ;;  %v404_v10 = vpop.f32.mrb[1].mxu0 }
  0xf4   : > { %v405_v11 = vadd.f32 %v404_v10, %v323_v7 }
  0xf5   : > { %v407_v13 = vmax.f32 %v403_v9, 0.0 }
  0xf6   : > { %v408_v12 = vmax.f32 %v405_v11, 0.0 }
  0xf8   : > { %415 = vmatprep.subr.mxu1 %v408_v12 }
  0xf9   : > { %416 = vmatpush1.msra.mxu1 %v407_v13 }
  0xfa   : > { %666 = vmatmul.mubr.msk.f32.vlgmr.msra.gmra.mrb[0].mxu1 %vm411_vm2, %v410_v14 }
 0x1cd   : > { %v481_v22 = vpop.f32.mrb[0].mxu1 }
 0x1ce   : > { %v483_v23 = vpop.f32.mrb[1].mxu1 }
 0x1cf   : > { %v488_v25 = vcombine.low %v481_v22, %v483_v23 }
 0x1d1   : > { %v509_v26 = vadd.f32 %v507_v24, %v488_v25 }
 0x1d3   : > { %510 = vst [vmem:[%s288_s8] sm:$0xff] %v509_v26 }
 0x1d4   : > { %747 = shalt.err (!%p744_p5)
}
 0x1d5   : > { %s748_s17 = scalar_lea.hbm %s925_s12, 128  ;;  %s752_s27 = scalar_lea.hbm %s977_s5, 256 }
 0x1d6   : > { %p749_p6 = scmp.ne.s32.totalorder %s925_s12, %s748_s17  ;;  %p753_p10 = scmp.lt.u32.totalorder %s925_s12, %s977_s5 }
 0x1d7   : > { %p754_p11 = scmp.lt.u32.totalorder %s752_s27, %s748_s17  ;;  %p756_p13 = scmp.lt.u32.totalorder %s748_s17, %s925_s12 }
 0x1d8   : > { %p750_p7 = pnand %p749_p6, %p888_p4 }
 0x1d9   : > { %p755_p12 = por %p754_p11, %p753_p10 }
 0x1da   : > { %p751_p9 = pneg %p750_p7 }
 0x1db   : > { %p757_p0 = por %p756_p13, %p755_p12 }
 0x1dd   : > { %p758_p1 = pnand %p757_p0, %p751_p9 }
 0x1df   : > { %761 = shalt.err (!%p758_p1)
}
 0x1e0   : > { %674 = dma.vmem_to_hbm [thread:$0]  (%p888_p4), %s927_s9, 128, %s925_s12, %s512_s13  }
 0x1e1 PF: > { %p680_p2 = scmp.ge.s32.totalorder %s812_s23, 2  ;;  %s540_s8 = sand.u32 1, %s792_s18  }
 0x1e2   : > { %s541_s10 = scalar_lea.sflag [#allocation4], %s540_s8 }
 0x1e3   : > { %p677_p3 = pnand %p680_p2, %p895_p8 }
 0x1e5   : > { %787 = dma.done.wait (!%p677_p3), %s541_s10, 128  }
 0x1e6   : > { %789 = vsyncadd (!%p677_p3), %s541_s10, 4294967168  ;;  %s18_s23 = sadd.s32 1, %s812_s23   ;;  %s980_s18 = smov %s796_s19 }
 0x1e7   : > { %p15_p5 = scmp.ge.s32.totalorder %s18_s23, 4   ;;  %s981_s19 = smov %s800_s20 }
 0x1e8   : > { %s982_s20 = smov %s901_s6  ;;  %s983_s21 = smov %s808_s22 }
 0x1e9   : > { %s984_s22 = smov %s986_s26  ;;  %17 = sbr.rel (!%p15_p5) target bundleno = 4 (0x4), region = 92 }
 0x1f0   :  { %546 = vsyncpa [#allocation4], 1 }
 0x1f1   :  { %548 = vsyncpa [#allocation4 + $0x1], 1 }

</bundles_post_ra>
